<compile_context>
chip_gen: v7x
topology: tpu7x:2x2x1
jax: 0.10.0
libtpu: 0.0.40
codegen_flags: <defaults>
</compile_context>

<pallas_src>
import functools

import jax
import jax.numpy as jnp
from jax.experimental import pallas as pl
from jax.experimental.pallas import tpu as pltpu

HIDDEN = 64
PAD = 128  # lane-dense width used internally for all feature dims


def _round_up(x, m):
    return ((x + m - 1) // m) * m


def _policy_kernel(x_ref, w_ref, b_ref, o_ref, xpad_ref, *,
                   state_size, action_size):
    # x_ref:   (tb, state_size) f32   -- raw state tile straight from HBM
    # w_ref:   (3, 128, 128)    bf16  -- packed, VMEM-resident weights
    # b_ref:   (3, 128)         f32   -- packed biases
    # o_ref:   (tb, action_size) f32  -- only the valid action lanes
    # xpad_ref:(tb, 128)        f32   -- scratch used to lane-pad the state

    # In-kernel pad to 128 lanes (masked vst, then full reload) so the MXU sees
    # a lane-dense operand while only state_size*4 bytes/row came from HBM.
    xpad_ref[...] = jnp.zeros_like(xpad_ref)
    xpad_ref[:, :state_size] = x_ref[...]
    x = xpad_ref[...].astype(jnp.bfloat16)

    w1 = w_ref[0]
    w2 = w_ref[1]
    w3 = w_ref[2]
    b1 = b_ref[0:1, :]
    b2 = b_ref[1:2, :]
    b3 = b_ref[2:3, :]

    # fc1 + relu   (bf16 MXU operands, f32 accumulation, f32 elementwise)
    h1 = jnp.dot(x, w1, preferred_element_type=jnp.float32) + b1
    h1 = jnp.maximum(h1, 0.0)

    # fc2 + relu
    h2 = jnp.dot(h1.astype(jnp.bfloat16), w2,
                 preferred_element_type=jnp.float32) + b2
    h2 = jnp.maximum(h2, 0.0)

    # fc3 + softmax over the last dim.  Padded lanes (>= action_size) carry
    # exactly-zero logits (zero-padded W3/b3); mask them to a huge negative
    # f32 value so they contribute nothing to max/sum.
    logits = jnp.dot(h2.astype(jnp.bfloat16), w3,
                     preferred_element_type=jnp.float32) + b3
    lane = jax.lax.broadcasted_iota(jnp.int32, logits.shape, dimension=1)
    logits = jnp.where(lane < action_size, logits, -1e30)

    m = jnp.max(logits, axis=-1, keepdims=True)
    e = jnp.exp(logits - m)
    s = jnp.sum(e, axis=-1, keepdims=True)
    probs = e / s  # exact divide: kernel is memory-bound, accuracy is free
    o_ref[...] = probs[:, :action_size]


def pack_params(params):
    """Pad each (in,out) weight to (128,128) and each bias to (128,), stack.

    Call ONCE (outside jit / the per-step path) and reuse the packed slabs.
    """
    w1, b1, w2, b2, w3, b3 = params

    def pad_w(w):
        return jnp.zeros((PAD, PAD), jnp.float32).at[:w.shape[0], :w.shape[1]].set(w)

    def pad_b(b):
        b = b.reshape(-1)
        return jnp.zeros((PAD,), jnp.float32).at[:b.shape[0]].set(b)

    w_packed = jnp.stack([pad_w(w1), pad_w(w2), pad_w(w3)]).astype(jnp.bfloat16)
    b_packed = jnp.stack([pad_b(b1), pad_b(b2), pad_b(b3)])  # f32 (3, 128)
    return w_packed, b_packed


def _choose_tile(batch, *, max_tb=1024, min_steps=2):
    """Adaptive batch tile: cap at max_tb, bound tail padding, and keep at
    least `min_steps` grid steps when possible (v7x has 2 TensorCores)."""
    rows = _round_up(batch, 8)
    n_steps = max(pl.cdiv(rows, max_tb),      # respect the tile cap
                  min(min_steps, rows // 8),  # >=2 steps if batch allows
                  1)
    tb = _round_up(pl.cdiv(rows, n_steps), 8)
    padded_batch = _round_up(rows, tb)
    return tb, padded_batch


def policy_network_forward(state, w_packed, b_packed, *, action_size,
                           max_tb=1024):
    """state: (B, state_size) -> action_probs: (B, action_size) f32.

    w_packed/b_packed come from pack_params(params) (computed once)."""
    state = state.astype(jnp.float32)  # mirrors torch.FloatTensor(state)
    batch, state_size = state.shape
    assert state_size <= PAD and HIDDEN <= PAD and action_size <= PAD

    tb, padded_batch = _choose_tile(batch, max_tb=max_tb)
    grid = (padded_batch // tb,)

    # Only the batch (row) dim is padded; feature dims stay at their real size.
    if padded_batch != batch:
        state = jnp.pad(state, ((0, padded_batch - batch), (0, 0)))

    # Advisory cost: real (unpadded) HBM I/O, actual MXU work.
    cost = pl.CostEstimate(
        flops=2 * padded_batch * PAD * PAD * 3,
        transcendentals=padded_batch * PAD,
        bytes_accessed=(batch * state_size * 4          # real input
                        + w_packed.size * 2             # bf16 weight slab
                        + b_packed.size * 4             # f32 bias slab
                        + batch * action_size * 4),     # real output
    )

    out_padded = pl.pallas_call(
        functools.partial(_policy_kernel, state_size=state_size,
                          action_size=action_size),
        out_shape=jax.ShapeDtypeStruct((padded_batch, action_size), jnp.float32),
        grid=grid,
        in_specs=[
            pl.BlockSpec((tb, state_size), lambda i: (i, 0)),   # raw state tile
            pl.BlockSpec((3, PAD, PAD), lambda i: (0, 0, 0)),   # weights (resident)
            pl.BlockSpec((3, PAD), lambda i: (0, 0)),           # biases  (resident)
        ],
        out_specs=pl.BlockSpec((tb, action_size), lambda i: (i, 0)),
        scratch_shapes=[pltpu.VMEM((tb, PAD), jnp.float32)],    # in-kernel pad buf
        compiler_params=pltpu.CompilerParams(
            dimension_semantics=("parallel",),   # megacore sharding on v7x
            vmem_limit_bytes=32 * 1024 * 1024,   # safe on v5e/v6e/v7x
        ),
        cost_estimate=cost,
    )(state, w_packed, b_packed)

    return out_padded[:batch]  # row slice only; lanes already action_size-wide


def init_params(key, state_size, action_size):
    """PyTorch-default-style Linear init: U(-1/sqrt(fan_in), 1/sqrt(fan_in))."""
    keys = jax.random.split(key, 6)

    def linear(kw, kb, fan_in, fan_out):
        bound = 1.0 / jnp.sqrt(jnp.float32(fan_in))
        w = jax.random.uniform(kw, (fan_in, fan_out), jnp.float32, -bound, bound)
        b = jax.random.uniform(kb, (1, fan_out), jnp.float32, -bound, bound)
        return w, b

    w1, b1 = linear(keys[0], keys[1], state_size, HIDDEN)
    w2, b2 = linear(keys[2], keys[3], HIDDEN, HIDDEN)
    w3, b3 = linear(keys[4], keys[5], HIDDEN, action_size)
    return (w1, b1, w2, b2, w3, b3)


def _reference_forward(state, params):
    w1, b1, w2, b2, w3, b3 = params
    h1 = jnp.maximum(state @ w1 + b1, 0.0)
    h2 = jnp.maximum(h1 @ w2 + b2, 0.0)
    return jax.nn.softmax(h2 @ w3 + b3, axis=-1)


if __name__ == "__main__":
    key = jax.random.PRNGKey(0)
    k_state, k_params, k_big = jax.random.split(key, 3)

    batch, state_size, action_size = 8, 4, 6
    state = jax.random.normal(k_state, (batch, state_size), dtype=jnp.float32)
    params = init_params(k_params, state_size, action_size)

    # Pack/pad/cast the weights ONCE, outside the per-call path.
    w_packed, b_packed = pack_params(params)
    w_packed = jax.device_put(w_packed)
    b_packed = jax.device_put(b_packed)

    fwd = jax.jit(policy_network_forward,
                  static_argnames=("action_size", "max_tb"))

    # Small case (matches the original toy shapes): single-tile grid.
    probs = jax.block_until_ready(
        fwd(state, w_packed, b_packed, action_size=action_size))
    ref = _reference_forward(state, params)
    assert probs.shape == (batch, action_size)
    # bf16 MXU operands -> modest tolerance vs the f32 reference.
    assert jnp.allclose(probs, ref, atol=2e-2), "mismatch vs pure-JAX reference"
    assert jnp.allclose(jnp.sum(probs, axis=-1), 1.0, atol=1e-3)

    # Larger ragged batch: exercises the adaptive 2-step pipelined grid
    # (1000 rows -> 2 tiles of 504, 8 padded tail rows discarded) which also
    # feeds both TensorCores on v7x.
    big_batch = 1000
    big_state = jax.random.normal(k_big, (big_batch, state_size), dtype=jnp.float32)
    big_probs = jax.block_until_ready(
        fwd(big_state, w_packed, b_packed, action_size=action_size))
    big_ref = _reference_forward(big_state, params)
    assert big_probs.shape == (big_batch, action_size)
    assert jnp.allclose(big_probs, big_ref, atol=2e-2)
    assert jnp.allclose(jnp.sum(big_probs, axis=-1), 1.0, atol=1e-3)

    print("KERNEL_OK")
</pallas_src>

<mosaic_0001>
module attributes {stable_mosaic.version = 11 : i64} {
  func.func @_policy_kernel(%arg0: i32, %arg1: memref<8x4xf32, #tpu.memory_space<vmem>>, %arg2: memref<3x128x128xbf16, #tpu.memory_space<vmem>>, %arg3: memref<3x128xf32, #tpu.memory_space<vmem>>, %arg4: memref<8x6xf32, #tpu.memory_space<vmem>>, %arg5: memref<8x128xf32, #tpu.memory_space<vmem>>) attributes {dimension_semantics = [#tpu.dimension_semantics<parallel>], iteration_bounds = array<i64: 1>, scalar_prefetch = 0 : i64, scratch_operands = 1 : i64, tpu.core_type = #tpu.core_type<tc>, window_params = [{transform_indices = @transform_0, window_bounds = array<i64: 8, 4>}, {pipeline_mode = #tpu.pipeline_mode<synchronous>, transform_indices = @transform_1, window_bounds = array<i64: 3, 128, 128>}, {pipeline_mode = #tpu.pipeline_mode<synchronous>, transform_indices = @transform_2, window_bounds = array<i64: 3, 128>}, {transform_indices = @transform_3, window_bounds = array<i64: 8, 6>}]} {
    %cst = arith.constant 0.000000e+00 : f32
    %0 = vector.broadcast %cst : f32 to vector<8x128xf32>
    %c0 = arith.constant 0 : index
    %c0_0 = arith.constant 0 : index
    %1 = vector.load %arg5[%c0, %c0_0] : memref<8x128xf32, #tpu.memory_space<vmem>>, vector<8x128xf32>
    tpu.vector_store %arg5[%c0, %c0_0], %0 {strides = array<i32>} : memref<8x128xf32, #tpu.memory_space<vmem>>, vector<8x128xf32>,
    %c0_1 = arith.constant 0 : index
    %c0_2 = arith.constant 0 : index
    %2 = vector.load %arg1[%c0_1, %c0_2] : memref<8x4xf32, #tpu.memory_space<vmem>>, vector<8x4xf32>
    %c0_3 = arith.constant 0 : index
    %c0_4 = arith.constant 0 : index
    %3 = vector.load %arg5[%c0_3, %c0_4] : memref<8x128xf32, #tpu.memory_space<vmem>>, vector<8x4xf32>
    tpu.vector_store %arg5[%c0_3, %c0_4], %2 {strides = array<i32>} : memref<8x128xf32, #tpu.memory_space<vmem>>, vector<8x4xf32>,
    %c0_5 = arith.constant 0 : index
    %c0_6 = arith.constant 0 : index
    %4 = vector.load %arg5[%c0_5, %c0_6] : memref<8x128xf32, #tpu.memory_space<vmem>>, vector<8x128xf32>
    %5 = arith.truncf %4 : vector<8x128xf32> to vector<8x128xbf16>
    %c0_7 = arith.constant 0 : index
    %c0_8 = arith.constant 0 : index
    %c0_9 = arith.constant 0 : index
    %6 = vector.load %arg2[%c0_7, %c0_8, %c0_9] : memref<3x128x128xbf16, #tpu.memory_space<vmem>>, vector<1x128x128xbf16>
    %7 = vector.shape_cast %6 : vector<1x128x128xbf16> to vector<128x128xbf16>
    %c1 = arith.constant 1 : index
    %c0_10 = arith.constant 0 : index
    %c0_11 = arith.constant 0 : index
    %8 = vector.load %arg2[%c1, %c0_10, %c0_11] : memref<3x128x128xbf16, #tpu.memory_space<vmem>>, vector<1x128x128xbf16>
    %9 = vector.shape_cast %8 : vector<1x128x128xbf16> to vector<128x128xbf16>
    %c2 = arith.constant 2 : index
    %c0_12 = arith.constant 0 : index
    %c0_13 = arith.constant 0 : index
    %10 = vector.load %arg2[%c2, %c0_12, %c0_13] : memref<3x128x128xbf16, #tpu.memory_space<vmem>>, vector<1x128x128xbf16>
    %11 = vector.shape_cast %10 : vector<1x128x128xbf16> to vector<128x128xbf16>
    %c0_14 = arith.constant 0 : index
    %c0_15 = arith.constant 0 : index
    %12 = vector.load %arg3[%c0_14, %c0_15] : memref<3x128xf32, #tpu.memory_space<vmem>>, vector<1x128xf32>
    %c1_16 = arith.constant 1 : index
    %c0_17 = arith.constant 0 : index
    %13 = vector.load %arg3[%c1_16, %c0_17] : memref<3x128xf32, #tpu.memory_space<vmem>>, vector<1x128xf32>
    %c2_18 = arith.constant 2 : index
    %c0_19 = arith.constant 0 : index
    %14 = vector.load %arg3[%c2_18, %c0_19] : memref<3x128xf32, #tpu.memory_space<vmem>>, vector<1x128xf32>
    %cst_20 = arith.constant dense<0.000000e+00> : vector<8x128xf32>
    %15 = tpu.matmul %5, %7, %cst_20 {dimension_numbers = #tpu.dot_dimension_numbers<[1], [0], [0], [1], [0, 0, 1, 1], [], []>} : vector<8x128xbf16>, vector<128x128xbf16>, vector<8x128xf32> -> vector<8x128xf32>
    %16 = vector.broadcast %12 : vector<1x128xf32> to vector<8x128xf32>
    %17 = arith.addf %15, %16 : vector<8x128xf32>
    %cst_21 = arith.constant 0.000000e+00 : f32
    %18 = vector.broadcast %cst_21 : f32 to vector<8x128xf32>
    %19 = arith.maximumf %17, %18 : vector<8x128xf32>
    %20 = arith.truncf %19 : vector<8x128xf32> to vector<8x128xbf16>
    %cst_22 = arith.constant dense<0.000000e+00> : vector<8x128xf32>
    %21 = tpu.matmul %20, %9, %cst_22 {dimension_numbers = #tpu.dot_dimension_numbers<[1], [0], [0], [1], [0, 0, 1, 1], [], []>} : vector<8x128xbf16>, vector<128x128xbf16>, vector<8x128xf32> -> vector<8x128xf32>
    %22 = vector.broadcast %13 : vector<1x128xf32> to vector<8x128xf32>
    %23 = arith.addf %21, %22 : vector<8x128xf32>
    %cst_23 = arith.constant 0.000000e+00 : f32
    %24 = vector.broadcast %cst_23 : f32 to vector<8x128xf32>
    %25 = arith.maximumf %23, %24 : vector<8x128xf32>
    %26 = arith.truncf %25 : vector<8x128xf32> to vector<8x128xbf16>
    %cst_24 = arith.constant dense<0.000000e+00> : vector<8x128xf32>
    %27 = tpu.matmul %26, %11, %cst_24 {dimension_numbers = #tpu.dot_dimension_numbers<[1], [0], [0], [1], [0, 0, 1, 1], [], []>} : vector<8x128xbf16>, vector<128x128xbf16>, vector<8x128xf32> -> vector<8x128xf32>
    %28 = vector.broadcast %14 : vector<1x128xf32> to vector<8x128xf32>
    %29 = arith.addf %27, %28 : vector<8x128xf32>
    %30 = tpu.iota {dimensions = array<i32: 1>} : vector<8x128xi32>
    %c6_i32 = arith.constant 6 : i32
    %31 = vector.broadcast %c6_i32 : i32 to vector<8x128xi32>
    %32 = arith.cmpi slt, %30, %31 : vector<8x128xi32>
    %cst_25 = arith.constant -1.000000e+30 : f32
    %33 = vector.broadcast %cst_25 : f32 to vector<8x128xf32>
    %34 = arith.select %32, %29, %33 : vector<8x128xi1>, vector<8x128xf32>
    %cst_26 = arith.constant dense<0xFF800000> : vector<8xf32>
    %35 = vector.multi_reduction <maximumf>, %34, %cst_26 [1] : vector<8x128xf32> to vector<8xf32>
    %36 = vector.shape_cast %35 : vector<8xf32> to vector<8x1xf32>
    %37 = vector.broadcast %36 : vector<8x1xf32> to vector<8x128xf32>
    %38 = arith.subf %34, %37 : vector<8x128xf32>
    %39 = math.exp %38 : vector<8x128xf32>
    %cst_27 = arith.constant dense<0.000000e+00> : vector<8xf32>
    %40 = vector.multi_reduction <add>, %39, %cst_27 [1] : vector<8x128xf32> to vector<8xf32>
    %41 = vector.shape_cast %40 : vector<8xf32> to vector<8x1xf32>
    %42 = vector.broadcast %41 : vector<8x1xf32> to vector<8x128xf32>
    %43 = arith.divf %39, %42 : vector<8x128xf32>
    %44 = vector.extract_strided_slice %43 {offsets = [0, 0], sizes = [8, 6], strides = [1, 1]} : vector<8x128xf32> to vector<8x6xf32>
    %c0_28 = arith.constant 0 : index
    %c0_29 = arith.constant 0 : index
    %45 = vector.load %arg4[%c0_28, %c0_29] : memref<8x6xf32, #tpu.memory_space<vmem>>, vector<8x6xf32>
    tpu.vector_store %arg4[%c0_28, %c0_29], %44 {strides = array<i32>} : memref<8x6xf32, #tpu.memory_space<vmem>>, vector<8x6xf32>,
    return
  }
  func.func @transform_0(%arg0: i32) -> (i32, i32) {
    %c0_i32 = arith.constant 0 : i32
    %c0_i32_0 = arith.constant 0 : i32
    return %arg0, %c0_i32 : i32, i32
  }
  func.func @transform_1(%arg0: i32) -> (i32, i32, i32) {
    %c0_i32 = arith.constant 0 : i32
    %c0_i32_0 = arith.constant 0 : i32
    %c0_i32_1 = arith.constant 0 : i32
    %c0_i32_2 = arith.constant 0 : i32
    return %c0_i32, %c0_i32_0, %c0_i32_1 : i32, i32, i32
  }
  func.func @transform_2(%arg0: i32) -> (i32, i32) {
    %c0_i32 = arith.constant 0 : i32
    %c0_i32_0 = arith.constant 0 : i32
    %c0_i32_1 = arith.constant 0 : i32
    return %c0_i32, %c0_i32_0 : i32, i32
  }
  func.func @transform_3(%arg0: i32) -> (i32, i32) {
    %c0_i32 = arith.constant 0 : i32
    %c0_i32_0 = arith.constant 0 : i32
    return %arg0, %c0_i32 : i32, i32
  }
}

</mosaic_0001>

<bundles_post_ra>
// kernel: policy_network_forward.1
= control target key start
LH: loop header
LB: loop body
LE: loop exit
PB: predicated region body
PF: predicated region fallthrough
CT: control target
= control target key end

     0   :  { %8 = vsyncpa [#allocation4], 0  ;;  %s688_s0 = inlined_call_operand.vmem [shape: f32[8,4], index: 0, kind: input, shape index: {}]   ;;  %s689_s1 = inlined_call_operand.hbm [shape: bf16[3,128,128], index: 1, kind: input, shape index: {}]   ;;  %s690_s2 = inlined_call_operand.vmem [shape: f32[3,128], index: 2, kind: input, shape index: {}]   ;;  %s691_s3 = inlined_call_operand.hbm [shape: f32[8,6], index: 3, kind: output, shape index: {}]  }
   0x1   :  { %9 = vsyncpa [#allocation5], 0  ;;  %s595_s12 = smov [#allocation3]   ;;  %s547_s16 = scalar_lea.hbm %s689_s1, 3072 }
   0x2   :  { %s17_s13 = sshll.u32 %s595_s12, 4  ;;  %p548_p0 = scmp.ne.s32.totalorder %s689_s1, %s547_s16  ;;  %s18_s13 = int_to_ptr.vmem [resolvable:$true] %s17_s13 }
   0x3   :  { %p551_p1 = scmp.lt.u32.totalorder %s547_s16, %s689_s1 }
   0x5   :  { %p553_p2 = pnand %p551_p1, %p548_p0 }
   0x7   :  { %556 = shalt.err (!%p553_p2)
}
   0x8   :  { %s557_s21 = scalar_lea.vmem %s18_s13, 3072  ;;  %p562_p4 = scmp.lt.s32.totalorder %s18_s13, %s18_s13 }
   0x9   :  { %p558_p3 = scmp.ne.s32.totalorder %s18_s13, %s557_s21  ;;  %p563_p5 = scmp.lt.s32.totalorder %s557_s21, %s557_s21 }
   0xb   :  { %p564_p6 = por %p563_p5, %p562_p4 }
   0xd   :  { %p565_p7 = pnand %p564_p6, %p558_p3 }
   0xf   :  { %568 = shalt.err (!%p565_p7)
}
  0x10   :  { %s596_s22 = smov 64   ;;  %s597_s23 = smov 4  }
  0x11   :  { %23 = dma.hbm_to_vmem [thread:$0]  %s689_s1, 3072, %s18_s13, [#allocation4], %s596_s22, %s596_s22, %s597_s23  }
  0x12   :  { %591 = dma.done.wait [#allocation4], 3072  }
  0x13   :  { %592 = vsyncadd [#allocation4], 4294964224  ;;  %v598_v0 = vmov 0.0   ;;  %vm599_vm0 = vmmov 0   ;;  %v519_v1 = vld [vmem:[#allocation3] sm:$0xff]   ;;  %v520_v2 = vld [vmem:[#allocation3 + $0x8] sm:$0xff]   ;;  %v369_v44 = vlaneseq }
  0x14   :  { %453 = vmatprep.subr.bf16.mxu0 %v598_v0  ;;  %30 = vst [vmem:[#allocation2] sm:$0xff] %v598_v0  ;;  %469 = vmatprep.mubr.msk.bf16.mxu0 %vm599_vm0, %v598_v0  ;;  %v521_v3 = vld [vmem:[#allocation3 + $0x10] sm:$0xff]   ;;  %vm32_vm1 = vcmask 31744   ;;  %v527_v5 = vld [vmem:[#allocation3 + $0x40] sm:$0xff]   ;;  %v522_v6 = vld [vmem:[#allocation3 + $0x18] sm:$0xff]   ;;  %s600_s5 = smov [#allocation6]  }
  0x15   :  { %473 = vmatprep.subr.bf16.mxu1 %v598_v0  ;;  %489 = vmatprep.mubr.msk.bf16.mxu1 %vm599_vm0, %v598_v0  ;;  %v31_v4 = vld [vmem:[%s688_s0] sm:$0xff]  ;;  %v528_v7 = vld [vmem:[#allocation3 + $0x48] sm:$0xff]   ;;  %v523_v8 = vld [vmem:[#allocation3 + $0x20] sm:$0xff]   ;;  %v370_v45 = vand.u32 127, %v369_v44  ;;  %s390_s6 = sshll.u32 %s600_s5, 4  ;;  %vm382_vm3 = vcmask 48128   ;;  %s391_s6 = int_to_ptr.vmem [resolvable:$true] %s390_s6 }
  0x16   :  { %454 = vmatpush3.bf16.msra.mxu0 %v519_v1  ;;  %33 = vst.msk [vmem:[#allocation2] sm:$0xff] %vm32_vm1, %v31_v4  ;;  %474 = vmatpush3.bf16.msra.mxu1 %v527_v5  ;;  %v529_v9 = vld [vmem:[#allocation3 + $0x50] sm:$0xff]   ;;  %v524_v10 = vld [vmem:[#allocation3 + $0x28] sm:$0xff]   ;;  %v530_v11 = vld [vmem:[#allocation3 + $0x58] sm:$0xff]   ;;  %p574_p9 = scmp.lt.s32.totalorder %s391_s6, %s391_s6 }
  0x17   :  { %455 = vmatprep.subr.bf16.mxu0 %v598_v0  ;;  %475 = vmatprep.subr.bf16.mxu1 %v598_v0  ;;  %v525_v12 = vld [vmem:[#allocation3 + $0x30] sm:$0xff]   ;;  %v531_v13 = vld [vmem:[#allocation3 + $0x60] sm:$0xff]   ;;  %v526_v14 = vld [vmem:[#allocation3 + $0x38] sm:$0xff]   ;;  %vm371_vm2 = vcmp.lt.s32.totalorder %v370_v45, 6 }
  0x18   :  { %v532_v16 = vld [vmem:[#allocation3 + $0x68] sm:$0xff]   ;;  %v533_v18 = vld [vmem:[#allocation3 + $0x70] sm:$0xff]   ;;  %v534_v19 = vld [vmem:[#allocation3 + $0x78] sm:$0xff]  }
  0x19   :  { %v535_v20 = vld [vmem:[#allocation3 + $0x80] sm:$0xff]   ;;  %v536_v21 = vld [vmem:[#allocation3 + $0x88] sm:$0xff]   ;;  %v537_v22 = vld [vmem:[#allocation3 + $0x90] sm:$0xff]  }
  0x1a   :  { %456 = vmatpush3.bf16.msra.mxu0 %v520_v2  ;;  %476 = vmatpush3.bf16.msra.mxu1 %v528_v7  ;;  %v538_v23 = vld [vmem:[#allocation3 + $0x98] sm:$0xff]   ;;  %v539_v24 = vld [vmem:[#allocation3 + $0xa0] sm:$0xff]   ;;  %v540_v25 = vld [vmem:[#allocation3 + $0xa8] sm:$0xff]  }
  0x1b   :  { %457 = vmatprep.subr.bf16.mxu0 %v598_v0  ;;  %477 = vmatprep.subr.bf16.mxu1 %v598_v0  ;;  %v399_v26 = vld [vmem:[%s690_s2] ss:$0 sm:$0xff]  ;;  %v542_v35 = vld [vmem:[#allocation3 + $0xb8] sm:$0xff]   ;;  %v408_v36 = vld [vmem:[%s690_s2 + $0x1] ss:$0 sm:$0xff] }
  0x1c   :  { %v541_v34 = vld [vmem:[#allocation3 + $0xb0] sm:$0xff]  }
  0x1d   :  { %v34_v15 = vld [vmem:[#allocation2] sm:$0xff]  ;;  %v417_v46 = vld [vmem:[%s690_s2 + $0x2] ss:$0 sm:$0xff]  ;;  %s569_s2 = scalar_lea.vmem %s391_s6, 128 }
  0x1e   :  { %458 = vmatpush3.bf16.msra.mxu0 %v521_v3  ;;  %478 = vmatpush3.bf16.msra.mxu1 %v529_v9  ;;  %v35_v17 = vpack.c.bf16 %v34_v15, %v34_v15  ;;  %p570_p8 = scmp.ne.s32.totalorder %s391_s6, %s569_s2  ;;  %p575_p10 = scmp.lt.s32.totalorder %s569_s2, %s569_s2 }
  0x1f   :  { %459 = vmatprep.subr.bf16.mxu0 %v598_v0  ;;  %479 = vmatprep.subr.bf16.mxu1 %v598_v0 }
  0x20   :  { %p576_p11 = por %p575_p10, %p574_p9 }
  0x22   :  { %460 = vmatpush3.bf16.msra.mxu0 %v522_v6  ;;  %480 = vmatpush3.bf16.msra.mxu1 %v530_v11  ;;  %p577_p12 = pnand %p576_p11, %p570_p8 }
  0x23   :  { %461 = vmatprep.subr.bf16.mxu0 %v598_v0  ;;  %481 = vmatprep.subr.bf16.mxu1 %v598_v0 }
  0x26   :  { %462 = vmatpush3.bf16.msra.mxu0 %v523_v8  ;;  %482 = vmatpush3.bf16.msra.mxu1 %v531_v13 }
  0x27   :  { %463 = vmatprep.subr.bf16.mxu0 %v598_v0  ;;  %483 = vmatprep.subr.bf16.mxu1 %v598_v0 }
  0x2a   :  { %464 = vmatpush3.bf16.msra.mxu0 %v524_v10  ;;  %484 = vmatpush3.bf16.msra.mxu1 %v532_v16 }
  0x2b   :  { %465 = vmatprep.subr.bf16.mxu0 %v598_v0  ;;  %485 = vmatprep.subr.bf16.mxu1 %v598_v0 }
  0x2e   :  { %466 = vmatpush3.bf16.msra.mxu0 %v525_v12  ;;  %486 = vmatpush3.bf16.msra.mxu1 %v533_v18 }
  0x2f   :  { %467 = vmatprep.subr.bf16.mxu0 %v598_v0  ;;  %487 = vmatprep.subr.bf16.mxu1 %v598_v0 }
  0x32   :  { %468 = vmatpush3.bf16.msra.mxu0 %v526_v14  ;;  %488 = vmatpush3.bf16.msra.mxu1 %v534_v19 }
  0x33   :  { %493 = vmatprep.subr.bf16.mxu0 %v598_v0 }
  0x35   :  { %470 = vmatmul.mubr.bf16.vlgmr.msra.gmra.mrb[0].mxu0 %v35_v17 }
  0x36   :  { %509 = vmatprep.mubr.msk.bf16.mxu0 %vm599_vm0, %v598_v0  ;;  %494 = vmatpush3.bf16.msra.mxu0 %v535_v20 }
  0x37   :  { %495 = vmatprep.subr.bf16.mxu0 %v598_v0 }
  0x3a   :  { %496 = vmatpush3.bf16.msra.mxu0 %v536_v21 }
  0x3b   :  { %497 = vmatprep.subr.bf16.mxu0 %v598_v0 }
  0x3e   :  { %498 = vmatpush3.bf16.msra.mxu0 %v537_v22 }
  0x3f   :  { %499 = vmatprep.subr.bf16.mxu0 %v598_v0 }
  0x42   :  { %500 = vmatpush3.bf16.msra.mxu0 %v538_v23 }
  0x43   :  { %501 = vmatprep.subr.bf16.mxu0 %v598_v0 }
  0x46   :  { %502 = vmatpush3.bf16.msra.mxu0 %v539_v24 }
  0x47   :  { %503 = vmatprep.subr.bf16.mxu0 %v598_v0 }
  0x4a   :  { %504 = vmatpush3.bf16.msra.mxu0 %v540_v25 }
  0x4b   :  { %505 = vmatprep.subr.bf16.mxu0 %v598_v0 }
  0x4e   :  { %506 = vmatpush3.bf16.msra.mxu0 %v541_v34 }
  0x4f   :  { %507 = vmatprep.subr.bf16.mxu0 %v598_v0 }
  0x52   :  { %508 = vmatpush3.bf16.msra.mxu0 %v542_v35 }
 0x108   :  { %v175_v27 = vpop.f32.mrb[0].mxu0 }
 0x109   :  { %v176_v28 = vadd.f32 %v399_v26, %v175_v27  ;;  %v471_v29 = vpop.f32.mrb[1].mxu0 }
 0x10a   :  { %v178_v30 = vpop.f32.mrb[2].mxu0 }
 0x10b   :  { %v181_v31 = vmax.f32 %v176_v28, 0.0  ;;  %v472_v32 = vpop.f32.mrb[3].mxu0 }
 0x10d   :  { %v182_v33 = vpack.c.bf16 %v181_v31, %v181_v31 }
 0x10f   :  { %490 = vmatmul.mubr.bf16.vlgmr.msra.gmra.mrb[0].mxu1 %v182_v33 }
 0x1e2   :  { %v269_v37 = vpop.f32.mrb[0].mxu1 }
 0x1e3   :  { %v270_v38 = vadd.f32 %v408_v36, %v269_v37  ;;  %v491_v39 = vpop.f32.mrb[1].mxu1 }
 0x1e4   :  { %v272_v40 = vpop.f32.mrb[2].mxu1 }
 0x1e5   :  { %v275_v41 = vmax.f32 %v270_v38, 0.0  ;;  %v492_v42 = vpop.f32.mrb[3].mxu1 }
 0x1e7   :  { %v276_v43 = vpack.c.bf16 %v275_v41, %v275_v41 }
 0x1e9   :  { %510 = vmatmul.mubr.bf16.vlgmr.msra.gmra.mrb[4].mxu0 %v276_v43 }
 0x2bc   :  { %v363_v47 = vpop.f32.mrb[4].mxu0 }
 0x2bd   :  { %v364_v48 = vadd.f32 %v417_v46, %v363_v47  ;;  %v511_v49 = vpop.f32.mrb[5].mxu0 }
 0x2be   :  { %v366_v50 = vpop.f32.mrb[6].mxu0 }
 0x2bf   :  { %v512_v51 = vpop.f32.mrb[7].mxu0  ;;  %v372_v52 = vsel %vm371_vm2, %v364_v48, -1e+30 }
 0x2c0   :  { %373 = vmax.xlane.f32.xlu0 %v372_v52 }
 0x34d   :  { %v374_v53 = vpop.xlane.xlu0 %373 }
 0x34e   :  { %v375_v54 = vsub.f32 %v372_v52, %v374_v53 }
 0x350   :  { %v376_v55 = vmul.f32 1.442695, %v375_v54 }
 0x352   :  { %543 = vpow2.f32 %v376_v55 }
 0x35c   :  { %v544_v56 = vpop.eup %543 }
 0x35d   :  { %378 = vadd.xlane.f32.xlu0 %v544_v56 }
 0x3ea   :  { %v379_v57 = vpop.xlane.xlu0 %378 }
 0x3eb   :  { %545 = vrcp.f32 %v379_v57 }
 0x3f5   :  { %v546_v58 = vpop.eup %545 }
 0x3f6   :  { %v381_v59 = vmul.f32 %v546_v58, %v544_v56 }
 0x3f8   :  { %383 = vst.msk [vmem:[#allocation6] sm:$0xff] %vm382_vm3, %v381_v59 }
 0x3f9   :  { %580 = shalt.err (!%p577_p12)
}
 0x3fa   :  { %s581_s9 = scalar_lea.hbm %s691_s3, 128 }
 0x3fb   :  { %p582_p13 = scmp.ne.s32.totalorder %s691_s3, %s581_s9  ;;  %p585_p0 = scmp.lt.u32.totalorder %s581_s9, %s691_s3 }
 0x3fd   :  { %p587_p1 = pnand %p585_p0, %p582_p13 }
 0x3ff   :  { %590 = shalt.err (!%p587_p1)
}
 0x400   :  { %393 = dma.vmem_to_hbm [thread:$0]  %s391_s6, 128, %s691_s3, [#allocation5]  }
 0x401   :  { %593 = dma.done.wait [#allocation5], 128  }
 0x402   :  { %594 = vsyncadd [#allocation5], 4294967168 }
 0x403   :  { %397 = vsyncpa [#allocation4], 1 }
 0x404   :  { %398 = vsyncpa [#allocation5], 1 }

</bundles_post_ra>
